<compile_context>
chip_gen: v7x
topology: tpu7x:2x2x1
jax: 0.10.0
libtpu: 0.0.40
codegen_flags: <defaults>
</compile_context>

<pallas_src>
import functools

import jax
import jax.numpy as jnp
from jax import lax
from jax.experimental import pallas as pl
from jax.experimental.pallas import tpu as pltpu


# ----------------------------- Pallas kernel --------------------------------
def _vivit_attention_kernel(xq_ref, xkv_ref, wq_ref, bq_ref, wkv_ref, bkv_ref,
                            wo_ref, bo_ref, o_ref, *, num_heads, head_dim):
    # xq_ref:  (1, TQ, H)    query-tile slice of hidden_states for this batch
    # xkv_ref: (1, S,  H)    full hidden_states for this batch (K/V source)
    # wq_ref:  (nh, H, hd)   bf16 per-head Q weight (W^T slice, scaling folded)
    # bq_ref:  (nh, 1, hd)   f32  per-head Q bias (scaling folded)
    # wkv_ref: (nh, H, 2*hd) bf16 fused per-head K|V weight
    # bkv_ref: (nh, 1, 2*hd) f32  fused per-head K|V bias
    # wo_ref:  (nh, hd, H)   bf16 per-head slice of output-projection W^T
    # bo_ref:  (1, H)        f32  output-projection bias
    # o_ref:   (1, TQ, H)    output tile (written once, lane-dense)
    x_q = xq_ref[0].astype(jnp.bfloat16)     # (TQ, H)
    x_kv = xkv_ref[0].astype(jnp.bfloat16)   # (S,  H)
    q_tile = o_ref.shape[1]
    hidden = o_ref.shape[2]

    def head_body(h, acc):
        # Q projection for the query tile (attention scaling already folded in).
        q = jnp.dot(x_q, wq_ref[h],
                    preferred_element_type=jnp.float32) + bq_ref[h]      # (TQ, hd)
        # Fused K|V projection over the full sequence.
        kv = jnp.dot(x_kv, wkv_ref[h],
                     preferred_element_type=jnp.float32) + bkv_ref[h]    # (S, 2hd)
        k = kv[:, :head_dim]
        v = kv[:, head_dim:]

        # scores = q @ k^T (contract hd); bf16 MXU operands, f32 accumulation.
        scores = lax.dot_general(q.astype(jnp.bfloat16), k.astype(jnp.bfloat16),
                                 (((1,), (1,)), ((), ())),
                                 preferred_element_type=jnp.float32)     # (TQ, S)
        scores = scores - jnp.max(scores, axis=-1, keepdims=True)
        p = jnp.exp(scores)
        denom = jnp.sum(p, axis=-1, keepdims=True)                       # (TQ, 1)

        ctx = jnp.dot(p.astype(jnp.bfloat16), v.astype(jnp.bfloat16),
                      preferred_element_type=jnp.float32)                # (TQ, hd)
        # Defer softmax normalization to the small (TQ, hd) context; EUP recip.
        ctx = ctx * pl.reciprocal(denom, approx=True)

        partial = jnp.dot(ctx.astype(jnp.bfloat16), wo_ref[h],
                          preferred_element_type=jnp.float32)            # (TQ, H)
        return acc + partial

    acc = lax.fori_loop(0, num_heads, head_body,
                        jnp.zeros((q_tile, hidden), jnp.float32), unroll=True)
    o_ref[0] = (acc + bo_ref[...]).astype(o_ref.dtype)


def _choose_q_tile(seq_len, target=512):
    """Largest multiple-of-8 divisor of seq_len that is <= target, else seq_len."""
    if seq_len <= target:
        return seq_len
    for t in range(target - target % 8, 7, -8):
        if seq_len % t == 0:
            return t
    # TODO(synk): pad/mask ragged sequence lengths instead of falling back to full S.
    return seq_len


def vivit_attention(x, wq_h, bq_h, wkv_h, bkv_h, wo_h, bo_row, *,
                    q_tile=None, vmem_limit_bytes=32 * 1024 * 1024):
    """x: (B, S, H); wq_h: (nh, H, hd) bf16; bq_h: (nh, 1, hd);
    wkv_h: (nh, H, 2*hd) bf16; bkv_h: (nh, 1, 2*hd); wo_h: (nh, hd, H) bf16;
    bo_row: (1, H)."""
    B, S, H = x.shape
    nh, _, hd = wq_h.shape
    if q_tile is None:
        q_tile = _choose_q_tile(S)
    assert S % q_tile == 0 and (q_tile == S or q_tile % 8 == 0)
    n_q = S // q_tile

    kernel = functools.partial(_vivit_attention_kernel,
                               num_heads=nh, head_dim=hd)

    def resident(shape):
        # Fully-resident operand: same block for every grid step (DMA'd once).
        return pl.BlockSpec(shape, lambda b, qi: (0,) * len(shape))

    return pl.pallas_call(
        kernel,
        out_shape=jax.ShapeDtypeStruct((B, S, H), x.dtype),
        grid_spec=pltpu.PrefetchScalarGridSpec(
            num_scalar_prefetch=0,
            grid=(B, n_q),
            in_specs=[
                pl.BlockSpec((1, q_tile, H), lambda b, qi: (b, qi, 0)),  # x (q tile)
                pl.BlockSpec((1, S, H), lambda b, qi: (b, 0, 0)),        # x (K/V src)
                resident((nh, H, hd)),        # Wq (bf16, scaling folded)
                resident((nh, 1, hd)),        # bq (scaling folded)
                resident((nh, H, 2 * hd)),    # W_kv (bf16, fused)
                resident((nh, 1, 2 * hd)),    # b_kv (fused)
                resident((nh, hd, H)),        # Wo (bf16)
                resident((1, H)),             # bo
            ],
            out_specs=pl.BlockSpec((1, q_tile, H), lambda b, qi: (b, qi, 0)),
        ),
        compiler_params=pltpu.CompilerParams(
            dimension_semantics=("parallel", "parallel"),
            vmem_limit_bytes=vmem_limit_bytes),
    )(x, x, wq_h, bq_h, wkv_h, bkv_h, wo_h, bo_row)


# ------------------------------- Module glue --------------------------------
class VivitAttentionPallas:
    def __init__(self, *, hidden_size, num_attention_heads, qkv_bias=True, key):
        assert hidden_size % num_attention_heads == 0
        self.hidden_size = hidden_size
        self.num_heads = num_attention_heads
        self.head_dim = hidden_size // num_attention_heads
        self.scaling = float(self.head_dim) ** -0.5

        H, nh, hd = hidden_size, self.num_heads, self.head_dim
        ks = jax.random.split(key, 8)
        init = lambda k, shape: jax.random.normal(k, shape, jnp.float32) * 0.05
        zeros = jnp.zeros((H,), jnp.float32)
        # nn.Linear convention: weight (out, in); y = x @ W^T + b
        self.wq = init(ks[0], (H, H)); self.bq = init(ks[1], (H,)) if qkv_bias else zeros
        self.wk = init(ks[2], (H, H)); self.bk = init(ks[3], (H,)) if qkv_bias else zeros
        self.wv = init(ks[4], (H, H)); self.bv = init(ks[5], (H,)) if qkv_bias else zeros
        self.wo = init(ks[6], (H, H)); self.bo = init(ks[7], (H,))

        # Kernel layouts, built once: per-head pre-transposed W^T slices, bf16
        # for the MXU, attention scaling folded into Wq/bq, K|V fused on the
        # output (lane) dimension.
        def per_head(w):   # (H, H) nn.Linear weight -> (nh, H, hd) of W^T slices
            return w.reshape(nh, hd, H).transpose(0, 2, 1)

        wq_h = per_head(self.wq * self.scaling)
        wk_h = per_head(self.wk)
        wv_h = per_head(self.wv)
        self.wq_h = wq_h.astype(jnp.bfloat16)                         # (nh, H, hd)
        self.wkv_h = jnp.concatenate([wk_h, wv_h], -1).astype(jnp.bfloat16)  # (nh, H, 2hd)
        self.bq_h = (self.bq * self.scaling).reshape(nh, 1, hd)
        self.bkv_h = jnp.concatenate([self.bk.reshape(nh, 1, hd),
                                      self.bv.reshape(nh, 1, hd)], -1)  # (nh, 1, 2hd)
        self.wo_h = self.wo.T.reshape(nh, hd, H).astype(jnp.bfloat16)   # (nh, hd, H)
        self.bo_row = self.bo.reshape(1, H)
        # TODO(synk): head_mask, output_attentions (returning attention_probs)
        # and training-mode dropout are not implemented (eval-mode identities).

    def __call__(self, hidden_states):
        return vivit_attention(hidden_states, self.wq_h, self.bq_h,
                               self.wkv_h, self.bkv_h, self.wo_h, self.bo_row)

    # Pure-JAX f32 reference (eager attention path) for verification.
    def reference(self, hidden_states):
        B, S, H = hidden_states.shape
        nh, hd = self.num_heads, self.head_dim
        pr = lax.Precision.HIGHEST

        def lin(x, w, b):
            return jnp.einsum("bsh,oh->bso", x, w, precision=pr) + b

        def split(t):
            return t.reshape(B, S, nh, hd).transpose(0, 2, 1, 3)

        q = split(lin(hidden_states, self.wq, self.bq))
        k = split(lin(hidden_states, self.wk, self.bk))
        v = split(lin(hidden_states, self.wv, self.bv))
        scores = jnp.einsum("bhqd,bhkd->bhqk", q, k, precision=pr) * self.scaling
        probs = jax.nn.softmax(scores, axis=-1)
        ctx = jnp.einsum("bhqk,bhkd->bhqd", probs, v, precision=pr)
        ctx = ctx.transpose(0, 2, 1, 3).reshape(B, S, H)
        return jnp.einsum("bsh,oh->bso", ctx, self.wo, precision=pr) + self.bo


# ---------------------------------- main -------------------------------------
if __name__ == "__main__":
    key = jax.random.PRNGKey(0)
    k_params, k_input = jax.random.split(key)

    # Small config: batch=2, seq=8, hidden=32, heads=4 (head_dim=8)
    B, S, H, NH = 2, 8, 32, 4
    module = VivitAttentionPallas(hidden_size=H, num_attention_heads=NH,
                                  qkv_bias=True, key=k_params)
    hidden_states = jax.random.normal(k_input, (B, S, H), jnp.float32)

    out = module(hidden_states)
    out = jax.block_until_ready(out)

    ref = module.reference(hidden_states)
    assert out.shape == (B, S, H), out.shape
    max_err = float(jnp.max(jnp.abs(out - ref)))
    # bf16 MXU operands + approx reciprocal -> compare with bf16-level tolerance.
    assert jnp.allclose(out, ref, atol=3e-2, rtol=3e-2), f"mismatch {max_err}"

    print("KERNEL_OK")
</pallas_src>

<mosaic_0001>
module attributes {stable_mosaic.version = 11 : i64} {
  func.func @_vivit_attention_kernel(%arg0: i32, %arg1: i32, %arg2: memref<1x8x32xf32, #tpu.memory_space<vmem>>, %arg3: memref<1x8x32xf32, #tpu.memory_space<vmem>>, %arg4: memref<4x32x8xbf16, #tpu.memory_space<vmem>>, %arg5: memref<4x1x8xf32, #tpu.memory_space<vmem>>, %arg6: memref<4x32x16xbf16, #tpu.memory_space<vmem>>, %arg7: memref<4x1x16xf32, #tpu.memory_space<vmem>>, %arg8: memref<4x8x32xbf16, #tpu.memory_space<vmem>>, %arg9: memref<1x32xf32, #tpu.memory_space<vmem>>, %arg10: memref<1x8x32xf32, #tpu.memory_space<vmem>>) attributes {dimension_semantics = [#tpu.dimension_semantics<parallel>, #tpu.dimension_semantics<parallel>], iteration_bounds = array<i64: 2, 1>, scalar_prefetch = 0 : i64, scratch_operands = 0 : i64, tpu.core_type = #tpu.core_type<tc>, window_params = [{transform_indices = @transform_0, window_bounds = array<i64: 1, 8, 32>}, {transform_indices = @transform_1, window_bounds = array<i64: 1, 8, 32>}, {pipeline_mode = #tpu.pipeline_mode<synchronous>, transform_indices = @transform_2, window_bounds = array<i64: 4, 32, 8>}, {pipeline_mode = #tpu.pipeline_mode<synchronous>, transform_indices = @transform_3, window_bounds = array<i64: 4, 1, 8>}, {pipeline_mode = #tpu.pipeline_mode<synchronous>, transform_indices = @transform_4, window_bounds = array<i64: 4, 32, 16>}, {pipeline_mode = #tpu.pipeline_mode<synchronous>, transform_indices = @transform_5, window_bounds = array<i64: 4, 1, 16>}, {pipeline_mode = #tpu.pipeline_mode<synchronous>, transform_indices = @transform_6, window_bounds = array<i64: 4, 8, 32>}, {pipeline_mode = #tpu.pipeline_mode<synchronous>, transform_indices = @transform_7, window_bounds = array<i64: 1, 32>}, {transform_indices = @transform_8, window_bounds = array<i64: 1, 8, 32>}]} {
    %c0 = arith.constant 0 : index
    %c0_0 = arith.constant 0 : index
    %c0_1 = arith.constant 0 : index
    %0 = vector.load %arg2[%c0, %c0_0, %c0_1] : memref<1x8x32xf32, #tpu.memory_space<vmem>>, vector<1x8x32xf32>
    %1 = vector.shape_cast %0 : vector<1x8x32xf32> to vector<8x32xf32>
    %2 = arith.truncf %1 : vector<8x32xf32> to vector<8x32xbf16>
    %c0_2 = arith.constant 0 : index
    %c0_3 = arith.constant 0 : index
    %c0_4 = arith.constant 0 : index
    %3 = vector.load %arg3[%c0_2, %c0_3, %c0_4] : memref<1x8x32xf32, #tpu.memory_space<vmem>>, vector<1x8x32xf32>
    %4 = vector.shape_cast %3 : vector<1x8x32xf32> to vector<8x32xf32>
    %5 = arith.truncf %4 : vector<8x32xf32> to vector<8x32xbf16>
    %cst = arith.constant 0.000000e+00 : f32
    %6 = vector.broadcast %cst : f32 to vector<8x32xf32>
    %c0_i32 = arith.constant 0 : i32
    %7 = arith.index_cast %c0_i32 : i32 to index
    %c0_5 = arith.constant 0 : index
    %c0_6 = arith.constant 0 : index
    %8 = vector.load %arg4[%7, %c0_5, %c0_6] : memref<4x32x8xbf16, #tpu.memory_space<vmem>>, vector<1x32x8xbf16>
    %9 = vector.shape_cast %8 : vector<1x32x8xbf16> to vector<32x8xbf16>
    %cst_7 = arith.constant dense<0.000000e+00> : vector<8x8xf32>
    %10 = tpu.matmul %2, %9, %cst_7 {dimension_numbers = #tpu.dot_dimension_numbers<[1], [0], [0], [1], [0, 0, 1, 1], [], []>} : vector<8x32xbf16>, vector<32x8xbf16>, vector<8x8xf32> -> vector<8x8xf32>
    %11 = arith.index_cast %c0_i32 : i32 to index
    %c0_8 = arith.constant 0 : index
    %c0_9 = arith.constant 0 : index
    %12 = vector.load %arg5[%11, %c0_8, %c0_9] : memref<4x1x8xf32, #tpu.memory_space<vmem>>, vector<1x1x8xf32>
    %13 = vector.shape_cast %12 : vector<1x1x8xf32> to vector<1x8xf32>
    %14 = vector.broadcast %13 : vector<1x8xf32> to vector<8x8xf32>
    %15 = arith.addf %10, %14 : vector<8x8xf32>
    %16 = arith.index_cast %c0_i32 : i32 to index
    %c0_10 = arith.constant 0 : index
    %c0_11 = arith.constant 0 : index
    %17 = vector.load %arg6[%16, %c0_10, %c0_11] : memref<4x32x16xbf16, #tpu.memory_space<vmem>>, vector<1x32x16xbf16>
    %18 = vector.shape_cast %17 : vector<1x32x16xbf16> to vector<32x16xbf16>
    %cst_12 = arith.constant dense<0.000000e+00> : vector<8x16xf32>
    %19 = tpu.matmul %5, %18, %cst_12 {dimension_numbers = #tpu.dot_dimension_numbers<[1], [0], [0], [1], [0, 0, 1, 1], [], []>} : vector<8x32xbf16>, vector<32x16xbf16>, vector<8x16xf32> -> vector<8x16xf32>
    %20 = arith.index_cast %c0_i32 : i32 to index
    %c0_13 = arith.constant 0 : index
    %c0_14 = arith.constant 0 : index
    %21 = vector.load %arg7[%20, %c0_13, %c0_14] : memref<4x1x16xf32, #tpu.memory_space<vmem>>, vector<1x1x16xf32>
    %22 = vector.shape_cast %21 : vector<1x1x16xf32> to vector<1x16xf32>
    %23 = vector.broadcast %22 : vector<1x16xf32> to vector<8x16xf32>
    %24 = arith.addf %19, %23 : vector<8x16xf32>
    %25 = vector.extract_strided_slice %24 {offsets = [0, 0], sizes = [8, 8], strides = [1, 1]} : vector<8x16xf32> to vector<8x8xf32>
    %26 = vector.extract_strided_slice %24 {offsets = [0, 8], sizes = [8, 8], strides = [1, 1]} : vector<8x16xf32> to vector<8x8xf32>
    %27 = arith.truncf %15 : vector<8x8xf32> to vector<8x8xbf16>
    %28 = arith.truncf %25 : vector<8x8xf32> to vector<8x8xbf16>
    %cst_15 = arith.constant dense<0.000000e+00> : vector<8x8xf32>
    %29 = tpu.matmul %27, %28, %cst_15 {dimension_numbers = #tpu.dot_dimension_numbers<[1], [1], [0], [0], [0, 0, 1, 0], [], []>} : vector<8x8xbf16>, vector<8x8xbf16>, vector<8x8xf32> -> vector<8x8xf32>
    %cst_16 = arith.constant dense<0xFF800000> : vector<8xf32>
    %30 = vector.multi_reduction <maximumf>, %29, %cst_16 [1] : vector<8x8xf32> to vector<8xf32>
    %31 = vector.shape_cast %30 : vector<8xf32> to vector<8x1xf32>
    %32 = vector.broadcast %31 : vector<8x1xf32> to vector<8x8xf32>
    %33 = arith.subf %29, %32 : vector<8x8xf32>
    %34 = math.exp %33 : vector<8x8xf32>
    %cst_17 = arith.constant dense<0.000000e+00> : vector<8xf32>
    %35 = vector.multi_reduction <add>, %34, %cst_17 [1] : vector<8x8xf32> to vector<8xf32>
    %36 = vector.shape_cast %35 : vector<8xf32> to vector<8x1xf32>
    %37 = arith.truncf %34 : vector<8x8xf32> to vector<8x8xbf16>
    %38 = arith.truncf %26 : vector<8x8xf32> to vector<8x8xbf16>
    %cst_18 = arith.constant dense<0.000000e+00> : vector<8x8xf32>
    %39 = tpu.matmul %37, %38, %cst_18 {dimension_numbers = #tpu.dot_dimension_numbers<[1], [0], [0], [1], [0, 0, 1, 1], [], []>} : vector<8x8xbf16>, vector<8x8xbf16>, vector<8x8xf32> -> vector<8x8xf32>
    %40 = tpu.reciprocal %36 {approx = true} : vector<8x1xf32> -> vector<8x1xf32>
    %41 = vector.broadcast %40 : vector<8x1xf32> to vector<8x8xf32>
    %42 = arith.mulf %39, %41 : vector<8x8xf32>
    %43 = arith.truncf %42 : vector<8x8xf32> to vector<8x8xbf16>
    %44 = arith.index_cast %c0_i32 : i32 to index
    %c0_19 = arith.constant 0 : index
    %c0_20 = arith.constant 0 : index
    %45 = vector.load %arg8[%44, %c0_19, %c0_20] : memref<4x8x32xbf16, #tpu.memory_space<vmem>>, vector<1x8x32xbf16>
    %46 = vector.shape_cast %45 : vector<1x8x32xbf16> to vector<8x32xbf16>
    %cst_21 = arith.constant dense<0.000000e+00> : vector<8x32xf32>
    %47 = tpu.matmul %43, %46, %cst_21 {dimension_numbers = #tpu.dot_dimension_numbers<[1], [0], [0], [1], [0, 0, 1, 1], [], []>} : vector<8x8xbf16>, vector<8x32xbf16>, vector<8x32xf32> -> vector<8x32xf32>
    %48 = arith.addf %6, %47 : vector<8x32xf32>
    %c1_i32 = arith.constant 1 : i32
    %49 = arith.index_cast %c1_i32 : i32 to index
    %c0_22 = arith.constant 0 : index
    %c0_23 = arith.constant 0 : index
    %50 = vector.load %arg4[%49, %c0_22, %c0_23] : memref<4x32x8xbf16, #tpu.memory_space<vmem>>, vector<1x32x8xbf16>
    %51 = vector.shape_cast %50 : vector<1x32x8xbf16> to vector<32x8xbf16>
    %cst_24 = arith.constant dense<0.000000e+00> : vector<8x8xf32>
    %52 = tpu.matmul %2, %51, %cst_24 {dimension_numbers = #tpu.dot_dimension_numbers<[1], [0], [0], [1], [0, 0, 1, 1], [], []>} : vector<8x32xbf16>, vector<32x8xbf16>, vector<8x8xf32> -> vector<8x8xf32>
    %53 = arith.index_cast %c1_i32 : i32 to index
    %c0_25 = arith.constant 0 : index
    %c0_26 = arith.constant 0 : index
    %54 = vector.load %arg5[%53, %c0_25, %c0_26] : memref<4x1x8xf32, #tpu.memory_space<vmem>>, vector<1x1x8xf32>
    %55 = vector.shape_cast %54 : vector<1x1x8xf32> to vector<1x8xf32>
    %56 = vector.broadcast %55 : vector<1x8xf32> to vector<8x8xf32>
    %57 = arith.addf %52, %56 : vector<8x8xf32>
    %58 = arith.index_cast %c1_i32 : i32 to index
    %c0_27 = arith.constant 0 : index
    %c0_28 = arith.constant 0 : index
    %59 = vector.load %arg6[%58, %c0_27, %c0_28] : memref<4x32x16xbf16, #tpu.memory_space<vmem>>, vector<1x32x16xbf16>
    %60 = vector.shape_cast %59 : vector<1x32x16xbf16> to vector<32x16xbf16>
    %cst_29 = arith.constant dense<0.000000e+00> : vector<8x16xf32>
    %61 = tpu.matmul %5, %60, %cst_29 {dimension_numbers = #tpu.dot_dimension_numbers<[1], [0], [0], [1], [0, 0, 1, 1], [], []>} : vector<8x32xbf16>, vector<32x16xbf16>, vector<8x16xf32> -> vector<8x16xf32>
    %62 = arith.index_cast %c1_i32 : i32 to index
    %c0_30 = arith.constant 0 : index
    %c0_31 = arith.constant 0 : index
    %63 = vector.load %arg7[%62, %c0_30, %c0_31] : memref<4x1x16xf32, #tpu.memory_space<vmem>>, vector<1x1x16xf32>
    %64 = vector.shape_cast %63 : vector<1x1x16xf32> to vector<1x16xf32>
    %65 = vector.broadcast %64 : vector<1x16xf32> to vector<8x16xf32>
    %66 = arith.addf %61, %65 : vector<8x16xf32>
    %67 = vector.extract_strided_slice %66 {offsets = [0, 0], sizes = [8, 8], strides = [1, 1]} : vector<8x16xf32> to vector<8x8xf32>
    %68 = vector.extract_strided_slice %66 {offsets = [0, 8], sizes = [8, 8], strides = [1, 1]} : vector<8x16xf32> to vector<8x8xf32>
    %69 = arith.truncf %57 : vector<8x8xf32> to vector<8x8xbf16>
    %70 = arith.truncf %67 : vector<8x8xf32> to vector<8x8xbf16>
    %cst_32 = arith.constant dense<0.000000e+00> : vector<8x8xf32>
    %71 = tpu.matmul %69, %70, %cst_32 {dimension_numbers = #tpu.dot_dimension_numbers<[1], [1], [0], [0], [0, 0, 1, 0], [], []>} : vector<8x8xbf16>, vector<8x8xbf16>, vector<8x8xf32> -> vector<8x8xf32>
    %cst_33 = arith.constant dense<0xFF800000> : vector<8xf32>
    %72 = vector.multi_reduction <maximumf>, %71, %cst_33 [1] : vector<8x8xf32> to vector<8xf32>
    %73 = vector.shape_cast %72 : vector<8xf32> to vector<8x1xf32>
    %74 = vector.broadcast %73 : vector<8x1xf32> to vector<8x8xf32>
    %75 = arith.subf %71, %74 : vector<8x8xf32>
    %76 = math.exp %75 : vector<8x8xf32>
    %cst_34 = arith.constant dense<0.000000e+00> : vector<8xf32>
    %77 = vector.multi_reduction <add>, %76, %cst_34 [1] : vector<8x8xf32> to vector<8xf32>
    %78 = vector.shape_cast %77 : vector<8xf32> to vector<8x1xf32>
    %79 = arith.truncf %76 : vector<8x8xf32> to vector<8x8xbf16>
    %80 = arith.truncf %68 : vector<8x8xf32> to vector<8x8xbf16>
    %cst_35 = arith.constant dense<0.000000e+00> : vector<8x8xf32>
    %81 = tpu.matmul %79, %80, %cst_35 {dimension_numbers = #tpu.dot_dimension_numbers<[1], [0], [0], [1], [0, 0, 1, 1], [], []>} : vector<8x8xbf16>, vector<8x8xbf16>, vector<8x8xf32> -> vector<8x8xf32>
    %82 = tpu.reciprocal %78 {approx = true} : vector<8x1xf32> -> vector<8x1xf32>
    %83 = vector.broadcast %82 : vector<8x1xf32> to vector<8x8xf32>
    %84 = arith.mulf %81, %83 : vector<8x8xf32>
    %85 = arith.truncf %84 : vector<8x8xf32> to vector<8x8xbf16>
    %86 = arith.index_cast %c1_i32 : i32 to index
    %c0_36 = arith.constant 0 : index
    %c0_37 = arith.constant 0 : index
    %87 = vector.load %arg8[%86, %c0_36, %c0_37] : memref<4x8x32xbf16, #tpu.memory_space<vmem>>, vector<1x8x32xbf16>
    %88 = vector.shape_cast %87 : vector<1x8x32xbf16> to vector<8x32xbf16>
    %cst_38 = arith.constant dense<0.000000e+00> : vector<8x32xf32>
    %89 = tpu.matmul %85, %88, %cst_38 {dimension_numbers = #tpu.dot_dimension_numbers<[1], [0], [0], [1], [0, 0, 1, 1], [], []>} : vector<8x8xbf16>, vector<8x32xbf16>, vector<8x32xf32> -> vector<8x32xf32>
    %90 = arith.addf %48, %89 : vector<8x32xf32>
    %c2_i32 = arith.constant 2 : i32
    %91 = arith.index_cast %c2_i32 : i32 to index
    %c0_39 = arith.constant 0 : index
    %c0_40 = arith.constant 0 : index
    %92 = vector.load %arg4[%91, %c0_39, %c0_40] : memref<4x32x8xbf16, #tpu.memory_space<vmem>>, vector<1x32x8xbf16>
    %93 = vector.shape_cast %92 : vector<1x32x8xbf16> to vector<32x8xbf16>
    %cst_41 = arith.constant dense<0.000000e+00> : vector<8x8xf32>
    %94 = tpu.matmul %2, %93, %cst_41 {dimension_numbers = #tpu.dot_dimension_numbers<[1], [0], [0], [1], [0, 0, 1, 1], [], []>} : vector<8x32xbf16>, vector<32x8xbf16>, vector<8x8xf32> -> vector<8x8xf32>
    %95 = arith.index_cast %c2_i32 : i32 to index
    %c0_42 = arith.constant 0 : index
    %c0_43 = arith.constant 0 : index
    %96 = vector.load %arg5[%95, %c0_42, %c0_43] : memref<4x1x8xf32, #tpu.memory_space<vmem>>, vector<1x1x8xf32>
    %97 = vector.shape_cast %96 : vector<1x1x8xf32> to vector<1x8xf32>
    %98 = vector.broadcast %97 : vector<1x8xf32> to vector<8x8xf32>
    %99 = arith.addf %94, %98 : vector<8x8xf32>
    %100 = arith.index_cast %c2_i32 : i32 to index
    %c0_44 = arith.constant 0 : index
    %c0_45 = arith.constant 0 : index
    %101 = vector.load %arg6[%100, %c0_44, %c0_45] : memref<4x32x16xbf16, #tpu.memory_space<vmem>>, vector<1x32x16xbf16>
    %102 = vector.shape_cast %101 : vector<1x32x16xbf16> to vector<32x16xbf16>
    %cst_46 = arith.constant dense<0.000000e+00> : vector<8x16xf32>
    %103 = tpu.matmul %5, %102, %cst_46 {dimension_numbers = #tpu.dot_dimension_numbers<[1], [0], [0], [1], [0, 0, 1, 1], [], []>} : vector<8x32xbf16>, vector<32x16xbf16>, vector<8x16xf32> -> vector<8x16xf32>
    %104 = arith.index_cast %c2_i32 : i32 to index
    %c0_47 = arith.constant 0 : index
    %c0_48 = arith.constant 0 : index
    %105 = vector.load %arg7[%104, %c0_47, %c0_48] : memref<4x1x16xf32, #tpu.memory_space<vmem>>, vector<1x1x16xf32>
    %106 = vector.shape_cast %105 : vector<1x1x16xf32> to vector<1x16xf32>
    %107 = vector.broadcast %106 : vector<1x16xf32> to vector<8x16xf32>
    %108 = arith.addf %103, %107 : vector<8x16xf32>
    %109 = vector.extract_strided_slice %108 {offsets = [0, 0], sizes = [8, 8], strides = [1, 1]} : vector<8x16xf32> to vector<8x8xf32>
    %110 = vector.extract_strided_slice %108 {offsets = [0, 8], sizes = [8, 8], strides = [1, 1]} : vector<8x16xf32> to vector<8x8xf32>
    %111 = arith.truncf %99 : vector<8x8xf32> to vector<8x8xbf16>
    %112 = arith.truncf %109 : vector<8x8xf32> to vector<8x8xbf16>
    %cst_49 = arith.constant dense<0.000000e+00> : vector<8x8xf32>
    %113 = tpu.matmul %111, %112, %cst_49 {dimension_numbers = #tpu.dot_dimension_numbers<[1], [1], [0], [0], [0, 0, 1, 0], [], []>} : vector<8x8xbf16>, vector<8x8xbf16>, vector<8x8xf32> -> vector<8x8xf32>
    %cst_50 = arith.constant dense<0xFF800000> : vector<8xf32>
    %114 = vector.multi_reduction <maximumf>, %113, %cst_50 [1] : vector<8x8xf32> to vector<8xf32>
    %115 = vector.shape_cast %114 : vector<8xf32> to vector<8x1xf32>
    %116 = vector.broadcast %115 : vector<8x1xf32> to vector<8x8xf32>
    %117 = arith.subf %113, %116 : vector<8x8xf32>
    %118 = math.exp %117 : vector<8x8xf32>
    %cst_51 = arith.constant dense<0.000000e+00> : vector<8xf32>
    %119 = vector.multi_reduction <add>, %118, %cst_51 [1] : vector<8x8xf32> to vector<8xf32>
    %120 = vector.shape_cast %119 : vector<8xf32> to vector<8x1xf32>
    %121 = arith.truncf %118 : vector<8x8xf32> to vector<8x8xbf16>
    %122 = arith.truncf %110 : vector<8x8xf32> to vector<8x8xbf16>
    %cst_52 = arith.constant dense<0.000000e+00> : vector<8x8xf32>
    %123 = tpu.matmul %121, %122, %cst_52 {dimension_numbers = #tpu.dot_dimension_numbers<[1], [0], [0], [1], [0, 0, 1, 1], [], []>} : vector<8x8xbf16>, vector<8x8xbf16>, vector<8x8xf32> -> vector<8x8xf32>
    %124 = tpu.reciprocal %120 {approx = true} : vector<8x1xf32> -> vector<8x1xf32>
    %125 = vector.broadcast %124 : vector<8x1xf32> to vector<8x8xf32>
    %126 = arith.mulf %123, %125 : vector<8x8xf32>
    %127 = arith.truncf %126 : vector<8x8xf32> to vector<8x8xbf16>
    %128 = arith.index_cast %c2_i32 : i32 to index
    %c0_53 = arith.constant 0 : index
    %c0_54 = arith.constant 0 : index
    %129 = vector.load %arg8[%128, %c0_53, %c0_54] : memref<4x8x32xbf16, #tpu.memory_space<vmem>>, vector<1x8x32xbf16>
    %130 = vector.shape_cast %129 : vector<1x8x32xbf16> to vector<8x32xbf16>
    %cst_55 = arith.constant dense<0.000000e+00> : vector<8x32xf32>
    %131 = tpu.matmul %127, %130, %cst_55 {dimension_numbers = #tpu.dot_dimension_numbers<[1], [0], [0], [1], [0, 0, 1, 1], [], []>} : vector<8x8xbf16>, vector<8x32xbf16>, vector<8x32xf32> -> vector<8x32xf32>
    %132 = arith.addf %90, %131 : vector<8x32xf32>
    %c3_i32 = arith.constant 3 : i32
    %133 = arith.index_cast %c3_i32 : i32 to index
    %c0_56 = arith.constant 0 : index
    %c0_57 = arith.constant 0 : index
    %134 = vector.load %arg4[%133, %c0_56, %c0_57] : memref<4x32x8xbf16, #tpu.memory_space<vmem>>, vector<1x32x8xbf16>
    %135 = vector.shape_cast %134 : vector<1x32x8xbf16> to vector<32x8xbf16>
    %cst_58 = arith.constant dense<0.000000e+00> : vector<8x8xf32>
    %136 = tpu.matmul %2, %135, %cst_58 {dimension_numbers = #tpu.dot_dimension_numbers<[1], [0], [0], [1], [0, 0, 1, 1], [], []>} : vector<8x32xbf16>, vector<32x8xbf16>, vector<8x8xf32> -> vector<8x8xf32>
    %137 = arith.index_cast %c3_i32 : i32 to index
    %c0_59 = arith.constant 0 : index
    %c0_60 = arith.constant 0 : index
    %138 = vector.load %arg5[%137, %c0_59, %c0_60] : memref<4x1x8xf32, #tpu.memory_space<vmem>>, vector<1x1x8xf32>
    %139 = vector.shape_cast %138 : vector<1x1x8xf32> to vector<1x8xf32>
    %140 = vector.broadcast %139 : vector<1x8xf32> to vector<8x8xf32>
    %141 = arith.addf %136, %140 : vector<8x8xf32>
    %142 = arith.index_cast %c3_i32 : i32 to index
    %c0_61 = arith.constant 0 : index
    %c0_62 = arith.constant 0 : index
    %143 = vector.load %arg6[%142, %c0_61, %c0_62] : memref<4x32x16xbf16, #tpu.memory_space<vmem>>, vector<1x32x16xbf16>
    %144 = vector.shape_cast %143 : vector<1x32x16xbf16> to vector<32x16xbf16>
    %cst_63 = arith.constant dense<0.000000e+00> : vector<8x16xf32>
    %145 = tpu.matmul %5, %144, %cst_63 {dimension_numbers = #tpu.dot_dimension_numbers<[1], [0], [0], [1], [0, 0, 1, 1], [], []>} : vector<8x32xbf16>, vector<32x16xbf16>, vector<8x16xf32> -> vector<8x16xf32>
    %146 = arith.index_cast %c3_i32 : i32 to index
    %c0_64 = arith.constant 0 : index
    %c0_65 = arith.constant 0 : index
    %147 = vector.load %arg7[%146, %c0_64, %c0_65] : memref<4x1x16xf32, #tpu.memory_space<vmem>>, vector<1x1x16xf32>
    %148 = vector.shape_cast %147 : vector<1x1x16xf32> to vector<1x16xf32>
    %149 = vector.broadcast %148 : vector<1x16xf32> to vector<8x16xf32>
    %150 = arith.addf %145, %149 : vector<8x16xf32>
    %151 = vector.extract_strided_slice %150 {offsets = [0, 0], sizes = [8, 8], strides = [1, 1]} : vector<8x16xf32> to vector<8x8xf32>
    %152 = vector.extract_strided_slice %150 {offsets = [0, 8], sizes = [8, 8], strides = [1, 1]} : vector<8x16xf32> to vector<8x8xf32>
    %153 = arith.truncf %141 : vector<8x8xf32> to vector<8x8xbf16>
    %154 = arith.truncf %151 : vector<8x8xf32> to vector<8x8xbf16>
    %cst_66 = arith.constant dense<0.000000e+00> : vector<8x8xf32>
    %155 = tpu.matmul %153, %154, %cst_66 {dimension_numbers = #tpu.dot_dimension_numbers<[1], [1], [0], [0], [0, 0, 1, 0], [], []>} : vector<8x8xbf16>, vector<8x8xbf16>, vector<8x8xf32> -> vector<8x8xf32>
    %cst_67 = arith.constant dense<0xFF800000> : vector<8xf32>
    %156 = vector.multi_reduction <maximumf>, %155, %cst_67 [1] : vector<8x8xf32> to vector<8xf32>
    %157 = vector.shape_cast %156 : vector<8xf32> to vector<8x1xf32>
    %158 = vector.broadcast %157 : vector<8x1xf32> to vector<8x8xf32>
    %159 = arith.subf %155, %158 : vector<8x8xf32>
    %160 = math.exp %159 : vector<8x8xf32>
    %cst_68 = arith.constant dense<0.000000e+00> : vector<8xf32>
    %161 = vector.multi_reduction <add>, %160, %cst_68 [1] : vector<8x8xf32> to vector<8xf32>
    %162 = vector.shape_cast %161 : vector<8xf32> to vector<8x1xf32>
    %163 = arith.truncf %160 : vector<8x8xf32> to vector<8x8xbf16>
    %164 = arith.truncf %152 : vector<8x8xf32> to vector<8x8xbf16>
    %cst_69 = arith.constant dense<0.000000e+00> : vector<8x8xf32>
    %165 = tpu.matmul %163, %164, %cst_69 {dimension_numbers = #tpu.dot_dimension_numbers<[1], [0], [0], [1], [0, 0, 1, 1], [], []>} : vector<8x8xbf16>, vector<8x8xbf16>, vector<8x8xf32> -> vector<8x8xf32>
    %166 = tpu.reciprocal %162 {approx = true} : vector<8x1xf32> -> vector<8x1xf32>
    %167 = vector.broadcast %166 : vector<8x1xf32> to vector<8x8xf32>
    %168 = arith.mulf %165, %167 : vector<8x8xf32>
    %169 = arith.truncf %168 : vector<8x8xf32> to vector<8x8xbf16>
    %170 = arith.index_cast %c3_i32 : i32 to index
    %c0_70 = arith.constant 0 : index
    %c0_71 = arith.constant 0 : index
    %171 = vector.load %arg8[%170, %c0_70, %c0_71] : memref<4x8x32xbf16, #tpu.memory_space<vmem>>, vector<1x8x32xbf16>
    %172 = vector.shape_cast %171 : vector<1x8x32xbf16> to vector<8x32xbf16>
    %cst_72 = arith.constant dense<0.000000e+00> : vector<8x32xf32>
    %173 = tpu.matmul %169, %172, %cst_72 {dimension_numbers = #tpu.dot_dimension_numbers<[1], [0], [0], [1], [0, 0, 1, 1], [], []>} : vector<8x8xbf16>, vector<8x32xbf16>, vector<8x32xf32> -> vector<8x32xf32>
    %174 = arith.addf %132, %173 : vector<8x32xf32>
    %c4_i32 = arith.constant 4 : i32
    %c0_73 = arith.constant 0 : index
    %c0_74 = arith.constant 0 : index
    %175 = vector.load %arg9[%c0_73, %c0_74] : memref<1x32xf32, #tpu.memory_space<vmem>>, vector<1x32xf32>
    %176 = vector.broadcast %175 : vector<1x32xf32> to vector<8x32xf32>
    %177 = arith.addf %174, %176 : vector<8x32xf32>
    %c0_75 = arith.constant 0 : index
    %c0_76 = arith.constant 0 : index
    %c0_77 = arith.constant 0 : index
    %178 = vector.load %arg10[%c0_75, %c0_76, %c0_77] : memref<1x8x32xf32, #tpu.memory_space<vmem>>, vector<1x8x32xf32>
    %179 = vector.shape_cast %178 : vector<1x8x32xf32> to vector<8x32xf32>
    %180 = vector.shape_cast %177 : vector<8x32xf32> to vector<1x8x32xf32>
    tpu.vector_store %arg10[%c0_75, %c0_76, %c0_77], %180 {strides = array<i32>} : memref<1x8x32xf32, #tpu.memory_space<vmem>>, vector<1x8x32xf32>,
    return
  }
  func.func @transform_0(%arg0: i32, %arg1: i32) -> (i32, i32, i32) {
    %c0_i32 = arith.constant 0 : i32
    %c0_i32_0 = arith.constant 0 : i32
    return %arg0, %arg1, %c0_i32 : i32, i32, i32
  }
  func.func @transform_1(%arg0: i32, %arg1: i32) -> (i32, i32, i32) {
    %c0_i32 = arith.constant 0 : i32
    %c0_i32_0 = arith.constant 0 : i32
    %c0_i32_1 = arith.constant 0 : i32
    return %arg0, %c0_i32, %c0_i32_0 : i32, i32, i32
  }
  func.func @transform_2(%arg0: i32, %arg1: i32) -> (i32, i32, i32) {
    %c0_i32 = arith.constant 0 : i32
    %c0_i32_0 = arith.constant 0 : i32
    %c0_i32_1 = arith.constant 0 : i32
    %c0_i32_2 = arith.constant 0 : i32
    return %c0_i32, %c0_i32_0, %c0_i32_1 : i32, i32, i32
  }
  func.func @transform_3(%arg0: i32, %arg1: i32) -> (i32, i32, i32) {
    %c0_i32 = arith.constant 0 : i32
    %c0_i32_0 = arith.constant 0 : i32
    %c0_i32_1 = arith.constant 0 : i32
    %c0_i32_2 = arith.constant 0 : i32
    return %c0_i32, %c0_i32_0, %c0_i32_1 : i32, i32, i32
  }
  func.func @transform_4(%arg0: i32, %arg1: i32) -> (i32, i32, i32) {
    %c0_i32 = arith.constant 0 : i32
    %c0_i32_0 = arith.constant 0 : i32
    %c0_i32_1 = arith.constant 0 : i32
    %c0_i32_2 = arith.constant 0 : i32
    return %c0_i32, %c0_i32_0, %c0_i32_1 : i32, i32, i32
  }
  func.func @transform_5(%arg0: i32, %arg1: i32) -> (i32, i32, i32) {
    %c0_i32 = arith.constant 0 : i32
    %c0_i32_0 = arith.constant 0 : i32
    %c0_i32_1 = arith.constant 0 : i32
    %c0_i32_2 = arith.constant 0 : i32
    return %c0_i32, %c0_i32_0, %c0_i32_1 : i32, i32, i32
  }
  func.func @transform_6(%arg0: i32, %arg1: i32) -> (i32, i32, i32) {
    %c0_i32 = arith.constant 0 : i32
    %c0_i32_0 = arith.constant 0 : i32
    %c0_i32_1 = arith.constant 0 : i32
    %c0_i32_2 = arith.constant 0 : i32
    return %c0_i32, %c0_i32_0, %c0_i32_1 : i32, i32, i32
  }
  func.func @transform_7(%arg0: i32, %arg1: i32) -> (i32, i32) {
    %c0_i32 = arith.constant 0 : i32
    %c0_i32_0 = arith.constant 0 : i32
    %c0_i32_1 = arith.constant 0 : i32
    return %c0_i32, %c0_i32_0 : i32, i32
  }
  func.func @transform_8(%arg0: i32, %arg1: i32) -> (i32, i32, i32) {
    %c0_i32 = arith.constant 0 : i32
    %c0_i32_0 = arith.constant 0 : i32
    return %arg0, %arg1, %c0_i32 : i32, i32, i32
  }
}

</mosaic_0001>

<bundles_post_ra>
// kernel: tpu_custom_call.1
= control target key start
LH: loop header
LB: loop body
LE: loop exit
PB: predicated region body
PF: predicated region fallthrough
CT: control target
= control target key end

     0   :  { %13 = vsyncpa [#allocation3], 0  ;;  %s2436_s0 = inlined_call_operand.vmem [shape: f32[2,8,32], index: 0, kind: input, shape index: {}]   ;;  %s2437_s1 = inlined_call_operand.vmem [shape: f32[2,8,32], index: 1, kind: input, shape index: {}]   ;;  %s2438_s2 = inlined_call_operand.vmem [shape: bf16[4,32,8], index: 2, kind: input, shape index: {}]   ;;  %s2439_s3 = inlined_call_operand.vmem [shape: f32[4,1,8], index: 3, kind: input, shape index: {}]   ;;  %s2440_s4 = inlined_call_operand.vmem [shape: bf16[4,32,16], index: 4, kind: input, shape index: {}]   ;;  %s2441_s5 = inlined_call_operand.vmem [shape: f32[4,1,16], index: 5, kind: input, shape index: {}]   ;;  %s2442_s6 = inlined_call_operand.vmem [shape: bf16[4,8,32], index: 6, kind: input, shape index: {}]   ;;  %s2443_s7 = inlined_call_operand.vmem [shape: f32[1,32], index: 7, kind: input, shape index: {}]   ;;  %s2444_s8 = inlined_call_operand.hbm [shape: f32[2,8,32], index: 8, kind: output, shape index: {}]  }
   0x1   :  { %15 = vsyncpa [#allocation3 + $0x1], 0  ;;  %s2106_s27 = smov 0   ;;  %s2108_s28 = smov 0  }
   0x2   :  { %s2110_s29 = smov 0   ;;  %s2112_s30 = smov 0  }
   0x3   :  { %s2114_s9 = smov 0   ;;  %s2116_s10 = smov 0  }
   0x4 LB: > { %s1613_s11 = sadd.s32 4294967295, %s2055_s10   ;;  %s1614_s12 = sadd.s32 4294967294, %s2055_s10   ;;  %s2055_s10 = sphi %s2116_s10, %s21_s10   ;;  %s2051_s9 = sphi %s2114_s9, %s2451_s9   ;;  %s2047_s30 = sphi %s2112_s30, %s2450_s30   ;;  %s2043_s29 = sphi %s2110_s29, %s2449_s29   ;;  %s2039_s28 = sphi %s2108_s28, %s2448_s28   ;;  %s2035_s27 = sphi %s2106_s27, %s2447_s27  }
   0x5   : > { %s33_s13 = sadd.s32 1, %s2051_s9  ;;  %s222_s14 = sadd.s32 1, %s2043_s29 }
   0x6   : > { %p35_p0 = scmp.ge.s32.totalorder %s33_s13, 2  ;;  %p232_p1 = scmp.ne.s32.totalorder %s2043_s29, %s2039_s28 }
   0x7   : > { %p233_p2 = scmp.eq.s32.totalorder %s1613_s11, 1  ;;  %p238_p3 = scmp.ne.s32.totalorder %s2039_s28, %s2035_s27 }
   0x8   : > { %s2453_s13 = smov (%p35_p0, %s33_s13), 0  ;;  %p239_p5 = scmp.eq.s32.totalorder %s1614_s12, 1 }
   0x9   : > { %p2146_p4 = por %p233_p2, %p232_p1  ;;  %s217_s16 = ssub.s32 %s2051_s9, %s2453_s13 }
   0xa   : > { %p1617_p6 = scmp.ge.s32.totalorder %s2055_s10, 1  ;;  %p220_p7 = scmp.eq.s32.totalorder %s217_s16, 0 }
   0xb   : > { %p2153_p8 = por %p239_p5, %p238_p3  ;;  %p292_p9 = scmp.lt.s32.totalorder %s2055_s10, 3 }
   0xc   : > { %s2159_s18 = scalar_select %p220_p7, %s2043_s29, %s222_s14  }
   0xd   : > { %p293_p10 = pnand %p1617_p6, %p292_p9 }
   0xe   : > { %v1945_v0 = vld [vmem:[%s2440_s4] sm:$0xff] (!%p293_p10)   ;;  %v2057_v1 = vmov (!%p293_p10), 0.0   ;;  %v1946_v2 = vld [vmem:[%s2440_s4 + $0x8] sm:$0xff] (!%p293_p10)   ;;  %vm2058_vm0 = vmmov (!%p293_p10), 0   ;;  %p332_p11 = scmp.lt.s32.totalorder (!%p293_p10), %s2047_s30, 1  ;;  %vm371_vm1 = vcmask (!%p293_p10), 261120  }
   0xf   : > { %296 = sbr.rel (%p293_p10) target bundleno = 3307 (0xceb), region = 52  ;;  %1759 = vmatprep.subr.bf16.mxu1 (!%p293_p10), %v2057_v1  ;;  %1751 = vmatprep.subr.bf16.mxu0 (!%p293_p10), %v2057_v1  ;;  %v1947_v3 = vld [vmem:[%s2438_s2] sm:$0xff] (!%p293_p10)   ;;  %v1948_v4 = vld [vmem:[%s2438_s2 + $0x8] sm:$0xff] (!%p293_p10)   ;;  %vm483_vm2 = vcmask (!%p293_p10), 64512   ;;  %s2059_s11 = smov (!%p293_p10), 120   ;;  %v1951_v29 = vld [vmem:[%s2438_s2 + $0x10] sm:$0xff] (!%p293_p10)  }
  0x10   : > { %1760 = vmatpush3.bf16.msra.mxu1 (!%p293_p10), %v1945_v0  ;;  %1763 = vmatprep.mubr.msk.bf16.mxu1 (!%p293_p10), %vm2058_vm0, %v2057_v1  ;;  %v1625_v9 = vld [vmem:[%s2441_s5] ss:$0 sm:$0xff] (!%p293_p10)  ;;  %v1952_v30 = vld [vmem:[%s2438_s2 + $0x18] sm:$0xff] (!%p293_p10)   ;;  %vm546_vm3 = vcmask (!%p293_p10), 1043456   ;;  %v1949_v37 = vld [vmem:[%s2440_s4 + $0x10] sm:$0xff] (!%p293_p10)   ;;  %s2060_s26 = smov (!%p293_p10), [#allocation2]  }
  0x11   : > { %1761 = vmatprep.subr.bf16.mxu1 (!%p293_p10), %v2057_v1  ;;  %1755 = vmatprep.mubr.msk.bf16.mxu0 (!%p293_p10), %vm2058_vm0, %v2057_v1  ;;  %v1621_v16 = vld [vmem:[%s2439_s3] ss:$0 sm:$0xff] (!%p293_p10)  ;;  %v1950_v39 = vld [vmem:[%s2440_s4 + $0x18] sm:$0xff] (!%p293_p10)   ;;  %v1645_v48 = vld [vmem:[%s2441_s5 + $0x1] ss:$0 sm:$0xff] (!%p293_p10) }
  0x12   : > { %1752 = vmatpush3.bf16.msra.mxu0 (!%p293_p10), %v1947_v3  ;;  %v1636_v53 = vld [vmem:[%s2439_s3 + $0x1] ss:$0 sm:$0xff] (!%p293_p10) }
  0x13   : > { %1753 = vmatprep.subr.bf16.mxu0 (!%p293_p10), %v2057_v1 }
  0x14   : > { %1762 = vmatpush3.bf16.msra.mxu1 (!%p293_p10), %v1946_v2 }
  0x15   : > { %1773 = vmatprep.subr.bf16.mxu1 (!%p293_p10), %v2057_v1 }
  0x16   : > { %s333_s25 = scalar_select %p332_p11, %s2047_s30, 1  ;;  %1754 = vmatpush3.bf16.msra.mxu0 %v1948_v4 }
  0x17   : > { %1767 = vmatprep.subr.bf16.mxu0 %v2057_v1 }
  0x18   : > { %s1619_s12 = sshll.u32 %s333_s25, 3 }
  0x19   : > { %s342_s19 = scalar_lea.vmem %s2437_s1, %s1619_s12  ;;  %s338_s22 = scalar_lea.vmem %s2436_s0, %s1619_s12 }
  0x1a   : > { %v346_v5 = vld [vmem:[%s342_s19] sm:$0xff]  ;;  %s1700_s19 = sshll.u32 %s2047_s30, 7 }
  0x1b   : > { %v344_v6 = vld [vmem:[%s338_s22] sm:$0xff]  ;;  %v2190_v7 = vpack.c.bf16 %v346_v5, %v346_v5  ;;  %s2388_s24 = scalar_lea.hbm %s2444_s8, %s1700_s19 }
  0x1c   : > { %v2192_v8 = vpack.c.bf16 %v344_v6, %v344_v6 }
  0x1d   : > { %1764 = vmatmul.mubr.msk.bf16.vlgmr.msra.gmra.mrb[0].mxu1 %vm371_vm1, %v2190_v7 }
  0x1e   : > { %1756 = vmatmul.mubr.msk.bf16.vlgmr.msra.gmra.mrb[0].mxu0 %vm371_vm1, %v2192_v8  ;;  %1775 = vmatprep.mubr.msk.bf16.mxu1 %vm2058_vm0, %v2057_v1 }
  0x1f   : > { %1769 = vmatprep.mubr.msk.bf16.mxu0 %vm2058_vm0, %v2057_v1 }
  0xf0   : > { %v475_v10 = vpop.f32.mrb[0].mxu1 }
  0xf1   : > { %v409_v11 = vpop.f32.mrb[0].mxu0  ;;  %v476_v12 = vadd.f32 %v1625_v9, %v475_v10  ;;  %v1765_v13 = vpop.f32.mrb[1].mxu1  ;;  %v593_v9 = vld [vmem:[%s2442_s6] sm:$0xf] }
  0xf2   : > { %v1757_v14 = vpop.f32.mrb[1].mxu0  ;;  %v478_v15 = vpop.f32.mrb[2].mxu1  ;;  %v410_v22 = vadd.f32 %v1621_v16, %v409_v11  ;;  %v886_v13 = vsel %vm546_vm3, %v593_v9, 0 }
  0xf3   : > { %v412_v17 = vpop.f32.mrb[2].mxu0  ;;  %v482_v18 = vpack.c.bf16 %v476_v12, %v476_v12  ;;  %v1766_v19 = vpop.f32.mrb[3].mxu1  ;;  %v1651_v14 = vld [vmem:[%s2442_s6 + $0x4] sm:$0xf] }
  0xf4   : > { %v1758_v20 = vpop.f32.mrb[3].mxu0  ;;  %v481_v23 = vpack.c.bf16 %v410_v22, %v410_v22  ;;  %v840_v15 = vsel %vm546_vm3, %v1651_v14, 0  ;;  %v1953_v19 = vld [vmem:[%s2440_s4 + $0x20] sm:$0xff]  }
  0xf5   : > { %v488_v21 = vsel %vm483_vm2, %v482_v18, 0 }
  0xf6   : > { %1768 = vmatpush3.bf16.xpose.msra.mxu0 %v488_v21  ;;  %v1954_v21 = vld [vmem:[%s2440_s4 + $0x28] sm:$0xff]  }
  0xf7   : > { %1779 = vmatprep.subr.bf16.mxu0 %v2057_v1 }
  0xfd   : > { %1770 = vmatmul.mubr.msk.bf16.vlgmr.msra.gmra.mrb[4].mxu0 %vm483_vm2, %v481_v23 }
  0xfe   : > { %1783 = vmatprep.mubr.msk.bf16.mxu0 %vm2058_vm0, %v2057_v1  ;;  %1780 = vmatpush3.bf16.msra.mxu0 %v1951_v29 }
  0xff   : > { %1781 = vmatprep.subr.bf16.mxu0 %v2057_v1 }
 0x102   : > { %1782 = vmatpush3.bf16.msra.mxu0 %v1952_v30 }
 0x103   : > { %1795 = vmatprep.subr.bf16.mxu0 %v2057_v1 }
 0x105   : > { %1784 = vmatmul.mubr.msk.bf16.vlgmr.msra.gmra.mrb[8].mxu0 %vm371_vm1, %v2192_v8 }
 0x106   : > { %1797 = vmatprep.mubr.msk.bf16.mxu0 %vm2058_vm0, %v2057_v1 }
 0x1d0   : > { %v524_v24 = vpop.f32.mrb[4].mxu0 }
 0x1d1   : > { %v1771_v25 = vpop.f32.mrb[5].mxu0  ;;  %v530_v26 = vsel %vm483_vm2, %v524_v24, -inf }
 0x1d2   : > { %531 = vmax.xlane.f32.xlu0 %v530_v26  ;;  %v527_v27 = vpop.f32.mrb[6].mxu0 }
 0x1d3   : > { %v1772_v28 = vpop.f32.mrb[7].mxu0 }
 0x1d4   : > { %v1955_v28 = vld [vmem:[%s2438_s2 + $0x20] sm:$0xff]  }
 0x1d8   : > { %v653_v40 = vpop.f32.mrb[8].mxu0 }
 0x1d9   : > { %v1785_v41 = vpop.f32.mrb[9].mxu0  ;;  %v654_v57 = vadd.f32 %v1636_v53, %v653_v40 }
 0x1da   : > { %v656_v42 = vpop.f32.mrb[10].mxu0 }
 0x1db   : > { %v1786_v43 = vpop.f32.mrb[11].mxu0  ;;  %v724_v58 = vpack.c.bf16 %v654_v57, %v654_v57 }
 0x1e8   : > { %541 = vrot.lane.b32.xlu0 %v482_v18, %s2059_s11 }
 0x25f   : > { %v532_v31 = vpop.xlane.xlu0 %531 }
 0x260   : > { %v533_v32 = vsub.f32 %v524_v24, %v532_v31  ;;  %v1956_v31 = vld [vmem:[%s2438_s2 + $0x28] sm:$0xff]  }
 0x262   : > { %v534_v33 = vmul.f32 1.442695, %v533_v32 }
 0x263   : > { %v542_v34 = vpop.permute.xlu0 %541 }
 0x264   : > { %1961 = vpow2.f32 %v534_v33  ;;  %v548_v35 = vsel %vm546_vm3, %v542_v34, 0 }
 0x265   : > { %1774 = vmatpush3.bf16.msra.mxu1 %v548_v35 }
 0x266   : > { %1787 = vmatprep.subr.bf16.mxu1 %v2057_v1 }
 0x26e   : > { %v1962_v36 = vpop.eup %1961 }
 0x26f   : > { %v539_v38 = vpack.c.bf16 %v1962_v36, %v1962_v36  ;;  %v536_v0 = vsel %vm483_vm2, %v1962_v36, 0.0  ;;  %v1668_v36 = vld [vmem:[%s2441_s5 + $0x2] ss:$0 sm:$0xff] }
 0x271   : > { %1776 = vmatmul.mubr.msk.bf16.vlgmr.msra.gmra.mrb[4].mxu1 %vm483_vm2, %v539_v38 }
 0x272   : > { %1788 = vmatpush3.bf16.msra.mxu1 %v1949_v37  ;;  %1791 = vmatprep.mubr.msk.bf16.mxu1 %vm2058_vm0, %v2057_v1 }
 0x273   : > { %1789 = vmatprep.subr.bf16.mxu1 %v2057_v1 }
 0x276   : > { %1790 = vmatpush3.bf16.msra.mxu1 %v1950_v39 }
 0x277   : > { %1801 = vmatprep.subr.bf16.mxu1 %v2057_v1 }
 0x279   : > { %1792 = vmatmul.mubr.msk.bf16.vlgmr.msra.gmra.mrb[8].mxu1 %vm371_vm1, %v2190_v7 }
 0x27a   : > { %1803 = vmatprep.mubr.msk.bf16.mxu1 %vm2058_vm0, %v2057_v1 }
 0x344   : > { %v584_v44 = vpop.f32.mrb[4].mxu1 }
 0x345   : > { %v1777_v45 = vpop.f32.mrb[5].mxu1 }
 0x346   : > { %v587_v46 = vpop.f32.mrb[6].mxu1 }
 0x347   : > { %v1778_v47 = vpop.f32.mrb[7].mxu1 }
 0x34c   : > { %v718_v49 = vpop.f32.mrb[8].mxu1 }
 0x34d   : > { %v719_v50 = vadd.f32 %v1645_v48, %v718_v49  ;;  %v1793_v51 = vpop.f32.mrb[9].mxu1 }
 0x34e   : > { %v721_v52 = vpop.f32.mrb[10].mxu1  ;;  %v1659_v51 = vld [vmem:[%s2439_s3 + $0x2] ss:$0 sm:$0xff] }
 0x34f   : > { %v725_v54 = vpack.c.bf16 %v719_v50, %v719_v50  ;;  %v1794_v55 = vpop.f32.mrb[11].mxu1 }
 0x351   : > { %v730_v56 = vsel %vm483_vm2, %v725_v54, 0 }
 0x352   : > { %1796 = vmatpush3.bf16.xpose.msra.mxu0 %v730_v56 }
 0x353   : > { %1807 = vmatprep.subr.bf16.mxu0 %v2057_v1 }
 0x359   : > { %1798 = vmatmul.mubr.msk.bf16.vlgmr.msra.gmra.mrb[12].mxu0 %vm483_vm2, %v724_v58 }
 0x35a   : > { %1809 = vmatprep.mubr.msk.bf16.mxu0 %vm2058_vm0, %v2057_v1  ;;  %1808 = vmatpush3.bf16.msra.mxu0 %v840_v15 }
 0x35b   : > { %1819 = vmatprep.subr.bf16.mxu0 %v2057_v1 }
 0x42c   : > { %v766_v59 = vpop.f32.mrb[12].mxu0 }
 0x42d   : > { %v1799_v60 = vpop.f32.mrb[13].mxu0  ;;  %v772_v61 = vsel %vm483_vm2, %v766_v59, -inf }
 0x42e   : > { %773 = vmax.xlane.f32.xlu1 %v772_v61  ;;  %v769_v62 = vpop.f32.mrb[14].mxu0 }
 0x42f   : > { %v1800_v63 = vpop.f32.mrb[15].mxu0 }
 0x43f   : > { %783 = vrot.lane.b32.xlu1 %v725_v54, %s2059_s11 }
 0x463   : > { %537 = vadd.xlane.f32.xlu1 %v536_v0 }
 0x4bb   : > { %v774_v2 = vpop.xlane.xlu1 %773 }
 0x4bc   : > { %v775_v3 = vsub.f32 %v766_v59, %v774_v2 }
 0x4be   : > { %v776_v4 = vmul.f32 1.442695, %v775_v3 }
 0x4bf   : > { %v784_v5 = vpop.permute.xlu1 %783 }
 0x4c0   : > { %1963 = vpow2.f32 %v776_v4  ;;  %v789_v6 = vsel %vm546_vm3, %v784_v5, 0 }
 0x4c1   : > { %1802 = vmatpush3.bf16.msra.mxu1 %v789_v6  ;;  %v1674_v6 = vld [vmem:[%s2442_s6 + $0x8] sm:$0xf] }
 0x4c2   : > { %1813 = vmatprep.subr.bf16.mxu1 %v2057_v1  ;;  %v1174_v9 = vsel %vm546_vm3, %v1674_v6, 0 }
 0x4ca   : > { %v1964_v10 = vpop.eup %1963 }
 0x4cb   : > { %v778_v11 = vsel %vm483_vm2, %v1964_v10, 0.0  ;;  %v781_v12 = vpack.c.bf16 %v1964_v10, %v1964_v10  ;;  %v1959_v10 = vld [vmem:[%s2438_s2 + $0x30] sm:$0xff]  }
 0x4cc   : > { %779 = vadd.xlane.f32.xlu0 %v778_v11  ;;  %v1960_v11 = vld [vmem:[%s2438_s2 + $0x38] sm:$0xff]  }
 0x4cd   : > { %1804 = vmatmul.mubr.msk.bf16.vlgmr.msra.gmra.mrb[12].mxu1 %vm483_vm2, %v781_v12 }
 0x4ce   : > { %1814 = vmatpush3.bf16.msra.mxu1 %v886_v13  ;;  %1815 = vmatprep.mubr.msk.bf16.mxu1 %vm2058_vm0, %v2057_v1 }
 0x4cf   : > { %1827 = vmatprep.subr.bf16.mxu1 %v2057_v1 }
 0x4f0   : > { %v538_v16 = vpop.xlane.xlu1 %537 }
 0x4f1   : > { %1965 = vrcp.f32 %v538_v16 }
 0x4fb   : > { %v1966_v17 = vpop.eup %1965 }
 0x4fc   : > { %v591_v18 = vmul.f32 %v1966_v17, %v584_v44 }
 0x4fe   : > { %v592_v20 = vpack.c.bf16 %v591_v18, %v591_v18  ;;  %v1957_v18 = vld [vmem:[%s2440_s4 + $0x30] sm:$0xff]  }
 0x500   : > { %1816 = vmatmul.mubr.msk.bf16.vlgmr.msra.gmra.mrb[16].mxu1 %vm483_vm2, %v592_v20 }
 0x501   : > { %1828 = vmatpush3.bf16.msra.mxu1 %v1953_v19  ;;  %1831 = vmatprep.mubr.msk.bf16.mxu1 %vm2058_vm0, %v2057_v1 }
 0x502   : > { %1829 = vmatprep.subr.bf16.mxu1 %v2057_v1 }
 0x505   : > { %1830 = vmatpush3.bf16.msra.mxu1 %v1954_v21 }
 0x506   : > { %1841 = vmatprep.subr.bf16.mxu1 %v2057_v1 }
 0x508   : > { %1832 = vmatmul.mubr.msk.bf16.vlgmr.msra.gmra.mrb[20].mxu1 %vm371_vm1, %v2190_v7 }
 0x509   : > { %1843 = vmatprep.mubr.msk.bf16.mxu1 %vm2058_vm0, %v2057_v1 }
 0x559   : > { %v780_v22 = vpop.xlane.xlu0 %779 }
 0x55a   : > { %1967 = vrcp.f32 %v780_v22 }
 0x564   : > { %v1968_v23 = vpop.eup %1967 }
 0x5a0   : > { %v825_v24 = vpop.f32.mrb[12].mxu1 }
 0x5a1   : > { %v832_v25 = vmul.f32 %v1968_v23, %v825_v24  ;;  %v1805_v26 = vpop.f32.mrb[13].mxu1 }
 0x5a2   : > { %v828_v27 = vpop.f32.mrb[14].mxu1 }
 0x5a3   : > { %v833_v29 = vpack.c.bf16 %v832_v25, %v832_v25  ;;  %v1806_v30 = vpop.f32.mrb[15].mxu1 }
 0x5a4   : > { %v1690_v30 = vld [vmem:[%s2441_s5 + $0x3] ss:$0 sm:$0xff] }
 0x5a5   : > { %1810 = vmatmul.mubr.msk.bf16.vlgmr.msra.gmra.mrb[16].mxu0 %vm483_vm2, %v833_v29 }
 0x5a6   : > { %1820 = vmatpush3.bf16.msra.mxu0 %v1955_v28  ;;  %1823 = vmatprep.mubr.msk.bf16.mxu0 %vm2058_vm0, %v2057_v1 }
 0x5a7   : > { %1821 = vmatprep.subr.bf16.mxu0 %v2057_v1 }
 0x5aa   : > { %1822 = vmatpush3.bf16.msra.mxu0 %v1956_v31 }
 0x5ab   : > { %1835 = vmatprep.subr.bf16.mxu0 %v2057_v1 }
 0x5ad   : > { %1824 = vmatmul.mubr.msk.bf16.vlgmr.msra.gmra.mrb[20].mxu0 %vm371_vm1, %v2192_v8 }
 0x5ae   : > { %1837 = vmatprep.mubr.msk.bf16.mxu0 %vm2058_vm0, %v2057_v1 }
 0x5d3   : > { %v922_v32 = vpop.f32.mrb[16].mxu1 }
 0x5d4   : > { %v1817_v33 = vpop.f32.mrb[17].mxu1 }
 0x5d5   : > { %v925_v34 = vpop.f32.mrb[18].mxu1 }
 0x5d6   : > { %v1818_v35 = vpop.f32.mrb[19].mxu1  ;;  %v1681_v34 = vld [vmem:[%s2439_s3 + $0x3] ss:$0 sm:$0xff] }
 0x5db   : > { %v1052_v37 = vpop.f32.mrb[20].mxu1 }
 0x5dc   : > { %v1053_v38 = vadd.f32 %v1668_v36, %v1052_v37  ;;  %v1833_v39 = vpop.f32.mrb[21].mxu1 }
 0x5dd   : > { %v1055_v40 = vpop.f32.mrb[22].mxu1 }
 0x5de   : > { %v1059_v41 = vpack.c.bf16 %v1053_v38, %v1053_v38  ;;  %v1834_v42 = vpop.f32.mrb[23].mxu1 }
 0x5e0   : > { %v1064_v43 = vsel %vm483_vm2, %v1059_v41, 0  ;;  %1117 = vrot.lane.b32.xlu1 %v1059_v41, %s2059_s11 }
 0x5e1   : > { %1836 = vmatpush3.bf16.xpose.msra.mxu0 %v1064_v43 }
 0x5e2   : > { %1847 = vmatprep.subr.bf16.mxu0 %v2057_v1 }
 0x652   : > { %v1118_v44 = vpop.permute.xlu1 %1117 }
 0x653   : > { %v1123_v45 = vsel %vm546_vm3, %v1118_v44, 0 }
 0x654   : > { %1842 = vmatpush3.bf16.msra.mxu1 %v1123_v45 }
 0x655   : > { %1853 = vmatprep.subr.bf16.mxu1 %v2057_v1 }
 0x678   : > { %v876_v46 = vpop.f32.mrb[16].mxu0 }
 0x679   : > { %v2313_v47 = vadd.f32 %v922_v32, %v876_v46  ;;  %v1811_v48 = vpop.f32.mrb[17].mxu0 }
 0x67a   : > { %v879_v49 = vpop.f32.mrb[18].mxu0 }
 0x67b   : > { %v1812_v50 = vpop.f32.mrb[19].mxu0 }
 0x680   : > { %v987_v52 = vpop.f32.mrb[20].mxu0 }
 0x681   : > { %v988_v53 = vadd.f32 %v1659_v51, %v987_v52  ;;  %v1825_v54 = vpop.f32.mrb[21].mxu0  ;;  %v1696_v52 = vld [vmem:[%s2442_s6 + $0xc] sm:$0xf] }
 0x682   : > { %v990_v55 = vpop.f32.mrb[22].mxu0 }
 0x683   : > { %v1058_v56 = vpack.c.bf16 %v988_v53, %v988_v53  ;;  %v1826_v57 = vpop.f32.mrb[23].mxu0  ;;  %v1463_v53 = vsel %vm546_vm3, %v1696_v52, 0 }
 0x685   : > { %1838 = vmatmul.mubr.msk.bf16.vlgmr.msra.gmra.mrb[24].mxu0 %vm483_vm2, %v1058_v56 }
 0x686   : > { %1849 = vmatprep.mubr.msk.bf16.mxu0 %vm2058_vm0, %v2057_v1  ;;  %1848 = vmatpush3.bf16.msra.mxu0 %v1174_v9 }
 0x687   : > { %1861 = vmatprep.subr.bf16.mxu0 %v2057_v1 }
 0x758   : > { %v1100_v58 = vpop.f32.mrb[24].mxu0 }
 0x759   : > { %v1839_v59 = vpop.f32.mrb[25].mxu0  ;;  %v1106_v60 = vsel %vm483_vm2, %v1100_v58, -inf }
 0x75a   : > { %1107 = vmax.xlane.f32.xlu0 %v1106_v60  ;;  %v1103_v61 = vpop.f32.mrb[26].mxu0 }
 0x75b   : > { %v1840_v62 = vpop.f32.mrb[27].mxu0 }
 0x7e7   : > { %v1108_v63 = vpop.xlane.xlu0 %1107 }
 0x7e8   : > { %v1109_v0 = vsub.f32 %v1100_v58, %v1108_v63  ;;  %v1698_v63 = vld [vmem:[%s2443_s7] ss:$0 sm:$0xff] }
 0x7ea   : > { %v1110_v2 = vmul.f32 1.442695, %v1109_v0 }
 0x7ec   : > { %1969 = vpow2.f32 %v1110_v2 }
 0x7f6   : > { %v1970_v3 = vpop.eup %1969 }
 0x7f7   : > { %v1112_v4 = vsel %vm483_vm2, %v1970_v3, 0.0  ;;  %v1115_v5 = vpack.c.bf16 %v1970_v3, %v1970_v3 }
 0x7f8   : > { %1113 = vadd.xlane.f32.xlu0 %v1112_v4 }
 0x7f9   : > { %1844 = vmatmul.mubr.msk.bf16.vlgmr.msra.gmra.mrb[24].mxu1 %vm483_vm2, %v1115_v5 }
 0x7fa   : > { %1857 = vmatprep.mubr.msk.bf16.mxu1 %vm2058_vm0, %v2057_v1  ;;  %1854 = vmatpush3.bf16.msra.mxu1 %v1959_v10 }
 0x7fb   : > { %1855 = vmatprep.subr.bf16.mxu1 %v2057_v1 }
 0x7fe   : > { %1856 = vmatpush3.bf16.msra.mxu1 %v1960_v11 }
 0x7ff   : > { %1869 = vmatprep.subr.bf16.mxu1 %v2057_v1 }
 0x801   : > { %1858 = vmatmul.mubr.msk.bf16.vlgmr.msra.gmra.mrb[28].mxu1 %vm371_vm1, %v2192_v8  ;;  %v1958_v8 = vld [vmem:[%s2440_s4 + $0x38] sm:$0xff]  }
 0x802   : > { %1871 = vmatprep.mubr.msk.bf16.mxu1 %vm2058_vm0, %v2057_v1 }
 0x885   : > { %v1114_v12 = vpop.xlane.xlu0 %1113 }
 0x886   : > { %1971 = vrcp.f32 %v1114_v12 }
 0x890   : > { %v1972_v13 = vpop.eup %1971 }
 0x8cc   : > { %v1159_v14 = vpop.f32.mrb[24].mxu1 }
 0x8cd   : > { %v1166_v15 = vmul.f32 %v1972_v13, %v1159_v14  ;;  %v1845_v16 = vpop.f32.mrb[25].mxu1 }
 0x8ce   : > { %v1162_v17 = vpop.f32.mrb[26].mxu1 }
 0x8cf   : > { %v1167_v19 = vpack.c.bf16 %v1166_v15, %v1166_v15  ;;  %v1846_v20 = vpop.f32.mrb[27].mxu1 }
 0x8d1   : > { %1850 = vmatmul.mubr.msk.bf16.vlgmr.msra.gmra.mrb[28].mxu0 %vm483_vm2, %v1167_v19 }
 0x8d2   : > { %1862 = vmatpush3.bf16.msra.mxu0 %v1957_v18  ;;  %1865 = vmatprep.mubr.msk.bf16.mxu0 %vm2058_vm0, %v2057_v1 }
 0x8d3   : > { %1863 = vmatprep.subr.bf16.mxu0 %v2057_v1 }
 0x8d4   : > { %v1276_v21 = vpop.f32.mrb[28].mxu1 }
 0x8d5   : > { %v1859_v22 = vpop.f32.mrb[29].mxu1  ;;  %v1277_v38 = vadd.f32 %v1681_v34, %v1276_v21 }
 0x8d6   : > { %1864 = vmatpush3.bf16.msra.mxu0 %v1958_v8  ;;  %v1279_v23 = vpop.f32.mrb[30].mxu1 }
 0x8d7   : > { %1875 = vmatprep.subr.bf16.mxu0 %v2057_v1  ;;  %v1860_v24 = vpop.f32.mrb[31].mxu1  ;;  %v1347_v39 = vpack.c.bf16 %v1277_v38, %v1277_v38 }
 0x8d9   : > { %1866 = vmatmul.mubr.msk.bf16.vlgmr.msra.gmra.mrb[32].mxu0 %vm371_vm1, %v2190_v7 }
 0x8da   : > { %1877 = vmatprep.mubr.msk.bf16.mxu0 %vm2058_vm0, %v2057_v1 }
 0x9a4   : > { %v1210_v25 = vpop.f32.mrb[28].mxu0 }
 0x9a5   : > { %v1216_v26 = vadd.f32 %v1210_v25, %v2313_v47  ;;  %v1851_v27 = vpop.f32.mrb[29].mxu0 }
 0x9a6   : > { %v1213_v28 = vpop.f32.mrb[30].mxu0 }
 0x9a7   : > { %v1852_v29 = vpop.f32.mrb[31].mxu0 }
 0x9ac   : > { %v1341_v31 = vpop.f32.mrb[32].mxu0 }
 0x9ad   : > { %v1342_v32 = vadd.f32 %v1690_v30, %v1341_v31  ;;  %v1867_v7 = vpop.f32.mrb[33].mxu0 }
 0x9ae   : > { %v1344_v33 = vpop.f32.mrb[34].mxu0 }
 0x9af   : > { %v1348_v35 = vpack.c.bf16 %v1342_v32, %v1342_v32  ;;  %v1868_v36 = vpop.f32.mrb[35].mxu0 }
 0x9b1   : > { %v1353_v37 = vsel %vm483_vm2, %v1348_v35, 0 }
 0x9b2   : > { %1870 = vmatpush3.bf16.xpose.msra.mxu1 %v1353_v37 }
 0x9b3   : > { %1881 = vmatprep.subr.bf16.mxu1 %v2057_v1 }
 0x9b9   : > { %1872 = vmatmul.mubr.msk.bf16.vlgmr.msra.gmra.mrb[32].mxu1 %vm483_vm2, %v1347_v39 }
 0x9ba   : > { %1883 = vmatprep.mubr.msk.bf16.mxu1 %vm2058_vm0, %v2057_v1  ;;  %1882 = vmatpush3.bf16.msra.mxu1 %v1463_v53 }
 0xa8c   : > { %v1389_v40 = vpop.f32.mrb[32].mxu1 }
 0xa8d   : > { %v1873_v41 = vpop.f32.mrb[33].mxu1  ;;  %v1395_v42 = vsel %vm483_vm2, %v1389_v40, -inf }
 0xa8e   : > { %1396 = vmax.xlane.f32.xlu0 %v1395_v42  ;;  %v1392_v43 = vpop.f32.mrb[34].mxu1 }
 0xa8f   : > { %v1874_v44 = vpop.f32.mrb[35].mxu1 }
 0xaa4   : > { %1406 = vrot.lane.b32.xlu0 %v1348_v35, %s2059_s11  ;;  %s329_s11 = sand.u32 1, %s2039_s28  }
 0xaa5   : > { %s1618_s12 = sshll.u32 %s329_s11, 3  ;;  %s1516_s30 = scalar_lea.sflag [#allocation3], %s329_s11 }
 0xaa6   : > { %s331_s20 = scalar_lea.vmem [#allocation2], %s1618_s12  ;;  %s1981_s12 = sshll.u32 %s2060_s26, 4  ;;  %s1982_s12 = int_to_ptr.vmem [resolvable:$false] %s1981_s12 }
 0xaa7   : > { %s1530_s21 = sshll.u32 %s331_s20, 4  ;;  %s1983_s14 = scalar_lea.vmem %s1982_s12, 256  ;;  %s2390_s21 = int_to_ptr.vmem [resolvable:$true] %s1530_s21 }
 0xaa8   : > { %s1977_s25 = scalar_lea.vmem %s2390_s21, 128  ;;  %p1984_p1 = scmp.lt.s32.totalorder %s2390_s21, %s1982_s12 }
 0xaa9   : > { %p1978_p12 = scmp.ne.s32.totalorder %s2390_s21, %s1977_s25  ;;  %p1985_p2 = scmp.lt.s32.totalorder %s1983_s14, %s1977_s25 }
 0xaab   : > { %p1979_p13 = pnand %p1978_p12, %p2146_p4  ;;  %p1986_p3 = por %p1985_p2, %p1984_p1 }
 0xaad   : > { %p1980_p0 = pneg %p1979_p13 }
 0xaaf   : > { %p1987_p5 = pnand %p1986_p3, %p1980_p0 }
 0xb1b   : > { %v1397_v45 = vpop.xlane.xlu0 %1396 }
 0xb1c   : > { %v1398_v46 = vsub.f32 %v1389_v40, %v1397_v45 }
 0xb1e   : > { %v1399_v47 = vmul.f32 1.442695, %v1398_v46 }
 0xb1f   : > { %v1407_v48 = vpop.permute.xlu0 %1406 }
 0xb20   : > { %1973 = vpow2.f32 %v1399_v47  ;;  %v1412_v49 = vsel %vm546_vm3, %v1407_v48, 0 }
 0xb21   : > { %1876 = vmatpush3.bf16.msra.mxu0 %v1412_v49 }
 0xb2a   : > { %v1974_v50 = vpop.eup %1973 }
 0xb2b   : > { %v1401_v1 = vsel %vm483_vm2, %v1974_v50, 0.0  ;;  %v1404_v51 = vpack.c.bf16 %v1974_v50, %v1974_v50 }
 0xb2c   : > { %1402 = vadd.xlane.f32.xlu1 %v1401_v1 }
 0xb2d   : > { %1878 = vmatmul.mubr.msk.bf16.vlgmr.msra.gmra.mrb[36].mxu0 %vm483_vm2, %v1404_v51 }
 0xbb9   : > { %v1403_v54 = vpop.xlane.xlu1 %1402 }
 0xbba   : > { %1975 = vrcp.f32 %v1403_v54 }
 0xbc4   : > { %v1976_v55 = vpop.eup %1975 }
 0xc00   : > { %v1448_v56 = vpop.f32.mrb[36].mxu0 }
 0xc01   : > { %v1455_v57 = vmul.f32 %v1976_v55, %v1448_v56  ;;  %v1879_v58 = vpop.f32.mrb[37].mxu0 }
 0xc02   : > { %v1451_v59 = vpop.f32.mrb[38].mxu0 }
 0xc03   : > { %v1456_v60 = vpack.c.bf16 %v1455_v57, %v1455_v57  ;;  %v1880_v61 = vpop.f32.mrb[39].mxu0 }
 0xc05   : > { %1884 = vmatmul.mubr.msk.bf16.vlgmr.msra.gmra.mrb[36].mxu1 %vm483_vm2, %v1456_v60 }
 0xcd8   : > { %v1499_v62 = vpop.f32.mrb[36].mxu1 }
 0xcd9   : > { %v1505_v0 = vadd.f32 %v1499_v62, %v1216_v26  ;;  %v1885_v2 = vpop.f32.mrb[37].mxu1 }
 0xcda   : > { %v1502_v3 = vpop.f32.mrb[38].mxu1 }
 0xcdb   : > { %v1513_v4 = vadd.f32 %v1698_v63, %v1505_v0  ;;  %v1886_v5 = vpop.f32.mrb[39].mxu1 }
 0xcdd   : > { %1514 = vst.msk [vmem:[%s331_s20] sm:$0xff] %vm371_vm1, %v1513_v4 }
 0xcde   : > { %1990 = shalt.err (!%p1987_p5)
}
 0xcdf   : > { %s1991_s11 = scalar_lea.hbm %s2388_s24, 128  ;;  %s1995_s20 = scalar_lea.hbm %s2444_s8, 256 }
 0xce0   : > { %p1992_p6 = scmp.ne.s32.totalorder %s2388_s24, %s1991_s11  ;;  %p1996_p10 = scmp.lt.u32.totalorder %s2388_s24, %s2444_s8 }
 0xce1   : > { %p1997_p11 = scmp.lt.u32.totalorder %s1995_s20, %s1991_s11  ;;  %p1999_p13 = scmp.lt.u32.totalorder %s1991_s11, %s2388_s24 }
 0xce2   : > { %p1993_p7 = pnand %p1992_p6, %p2146_p4 }
 0xce3   : > { %p1998_p12 = por %p1997_p11, %p1996_p10 }
 0xce4   : > { %p1994_p9 = pneg %p1993_p7 }
 0xce5   : > { %p2000_p0 = por %p1999_p13, %p1998_p12 }
 0xce7   : > { %p2001_p1 = pnand %p2000_p0, %p1994_p9 }
 0xce9   : > { %2004 = shalt.err (!%p2001_p1)
}
 0xcea   : > { %1887 = dma.vmem_to_hbm [thread:$0]  (%p2146_p4), %s2390_s21, 128, %s2388_s24, %s1516_s30  }
 0xceb PF: > { %p1893_p2 = scmp.ge.s32.totalorder %s2055_s10, 2  ;;  %s1542_s25 = sand.u32 1, %s2035_s27  }
 0xcec   : > { %s1543_s26 = scalar_lea.sflag [#allocation3], %s1542_s25 }
 0xced   : > { %p1890_p3 = pnand %p1893_p2, %p2153_p8 }
 0xcef   : > { %2030 = dma.done.wait (!%p1890_p3), %s1543_s26, 128  }
 0xcf0   : > { %2032 = vsyncadd (!%p1890_p3), %s1543_s26, 4294967168  ;;  %s21_s10 = sadd.s32 1, %s2055_s10   ;;  %s2447_s27 = smov %s2039_s28 }
 0xcf1   : > { %p18_p5 = scmp.ge.s32.totalorder %s21_s10, 4   ;;  %s2448_s28 = smov %s2043_s29 }
 0xcf2   : > { %s2449_s29 = smov %s2159_s18  ;;  %s2450_s30 = smov %s2051_s9 }
 0xcf3   : > { %s2451_s9 = smov %s2453_s13  ;;  %20 = sbr.rel (!%p18_p5) target bundleno = 4 (0x4), region = 105 }
 0xcfa   :  { %1548 = vsyncpa [#allocation3], 1 }
 0xcfb   :  { %1550 = vsyncpa [#allocation3 + $0x1], 1 }

</bundles_post_ra>
